<compile_context>
chip_gen: v5e
topology: v5e:2x2
jax: 0.10.0
libtpu: 0.0.40
codegen_flags: <defaults>
</compile_context>

<pallas_src>
import functools
import math

import jax
import jax.numpy as jnp
from jax import lax
from jax.experimental import pallas as pl
from jax.experimental.pallas import tpu as pltpu


# ----------------------------------------------------------------------------
# Kernel
# ----------------------------------------------------------------------------

def _cp_linear_kernel(x_ref, w_ref, m_ref, b_ref, o_ref, *, precision):
    # x_ref: (tm, tk)  activations        (compute dtype)
    # w_ref: (tn, tk)  weight             (compute dtype)
    # m_ref: (tn, tk)  CP mask            (compute dtype)
    # b_ref: (1, tn)   bias               (float32)
    # o_ref: (tm, tn)  output tile == f32 accumulator, resident across K
    k = pl.program_id(2)

    @pl.when(k == 0)
    def _():
        # Initialize the resident output tile with the bias -> added exactly
        # once, no separate epilogue needed.
        o_ref[...] = jnp.broadcast_to(b_ref[...], o_ref.shape)

    # Fused masking on the VPU (slack slots under MXU work), then contract the
    # last dim of x with the last dim of (W*mask)  ==  x @ (W*mask)^T, with no
    # explicit transpose.
    w_masked = w_ref[...] * m_ref[...]
    o_ref[...] += lax.dot_general(
        x_ref[...], w_masked,
        dimension_numbers=(((1,), (1,)), ((), ())),
        preferred_element_type=jnp.float32,
        precision=precision)


# ----------------------------------------------------------------------------
# Tiling / wrapper
# ----------------------------------------------------------------------------

def _cdiv(a, b):
    return (a + b - 1) // b


def _round_up(x, m):
    return _cdiv(x, m) * m


def _vmem_limit_bytes():
    # 128 MiB physical VMEM on v5e/v6e -> ~96 MiB budget; 64 MiB on v7x -> ~48.
    try:
        cap = int(pltpu.get_tpu_info().vmem_capacity_bytes)
    except Exception:
        cap = 64 * 1024 * 1024   # v7x-safe fallback
    return max(32 * 1024 * 1024, min((cap * 3) // 4, 100 * 1024 * 1024))


def _pick_tiles(m, n, k, operand_bytes, vmem_limit):
    """Pick (tm, tn, tk, k_pad): (8,128)-aligned (or full-dim) tiles sized to
    the per-generation VMEM budget and clamped to the problem size."""
    k_r = _round_up(max(k, 1), 128)
    budget = int(vmem_limit * 0.8)          # headroom for compiler scratch

    candidates = [
        (1024, 512, 2048), (512, 512, 2048), (512, 512, 1024),
        (512, 256, 1024), (256, 256, 512), (256, 128, 512),
        (128, 128, 256), (128, 128, 128), (8, 128, 128),
    ]
    chosen = None
    for tm, tn, tk in candidates:
        tm_c = tm if m >= tm else m          # full-dim block when smaller
        tn_c = tn if n >= tn else n
        if k_r <= tk:
            tk_c, k_pad = k_r, k_r
        else:
            steps = _cdiv(k_r, tk)
            tk_c = _round_up(_cdiv(k_r, steps), 128)
            k_pad = steps * tk_c
        # double-buffered x, w, mask tiles + double-buffered f32 out + bias
        ws = (2 * (tm_c * tk_c + 2 * tn_c * tk_c) * operand_bytes
              + 2 * tm_c * tn_c * 4 + 2 * tn_c * 4)
        chosen = (tm_c, tn_c, tk_c, k_pad)
        if ws <= budget:
            break

    tm_c, tn_c, tk_c, k_pad = chosen
    # v7x has two TensorCores: guarantee >= 2 blocks on a parallel axis when
    # the problem allows it, so the second core receives grid work.
    if _cdiv(m, tm_c) * _cdiv(n, tn_c) < 2:
        if m >= 16:
            tm_c = _round_up(_cdiv(m, 2), 8)
        elif n >= 256:
            tn_c = _round_up(_cdiv(n, 2), 128)
    return tm_c, tn_c, tk_c, k_pad


def cp_linear(x, weight, cp_mask, bias, *, compute_dtype=jnp.float32,
              precision=None):
    """y = x @ (weight * cp_mask)^T + bias with float32 accumulation/output.

    x:       (..., in_features)
    weight:  (out_features, in_features)
    cp_mask: (out_features, in_features)
    bias:    (out_features,)
    returns: (..., out_features) float32

    compute_dtype: dtype of the MXU operands (x, weight, mask).
        jnp.float32  -> matches the PyTorch module's explicit .float() casts.
        jnp.bfloat16 -> MXU-native fast path (f32 accumulation); ~3-6x faster
                        and half the HBM traffic, with small numeric drift.
    precision: optional lax.Precision for the dot (e.g. HIGHEST for the
        tightest f32 parity; the module itself documents TF32-style matmuls,
        so the default precision is faithful to its semantics).
    """
    orig_shape = x.shape
    out_features, in_features = weight.shape
    operand_bytes = jnp.dtype(compute_dtype).itemsize

    x2 = jnp.reshape(x, (-1, in_features)).astype(compute_dtype)
    w = weight.astype(compute_dtype)
    mask = cp_mask.astype(compute_dtype)   # binary mask rides in operand dtype
    b = bias.astype(jnp.float32).reshape(1, out_features)

    batch = x2.shape[0]
    vmem_limit = _vmem_limit_bytes()
    tm, tn, tk, k_pad = _pick_tiles(batch, out_features, in_features,
                                    operand_bytes, vmem_limit)

    # Only the contraction axis needs zero padding (zeros contribute nothing
    # to the dot products).  Ragged M / N last tiles are handled by Pallas'
    # masked output stores, so no padded copy of x is materialized for M.
    if k_pad != in_features:
        kp = k_pad - in_features
        x2 = jnp.pad(x2, ((0, 0), (0, kp)))
        w = jnp.pad(w, ((0, 0), (0, kp)))
        mask = jnp.pad(mask, ((0, 0), (0, kp)))

    grid = (_cdiv(batch, tm), _cdiv(out_features, tn), k_pad // tk)

    cost = pl.CostEstimate(
        flops=2 * batch * out_features * k_pad,
        transcendentals=0,
        bytes_accessed=int(x2.size * operand_bytes
                           + grid[0] * (w.size + mask.size) * operand_bytes
                           + b.size * 4
                           + batch * out_features * 4),
    )

    out = pl.pallas_call(
        functools.partial(_cp_linear_kernel, precision=precision),
        out_shape=jax.ShapeDtypeStruct((batch, out_features), jnp.float32),
        grid=grid,
        in_specs=[
            pl.BlockSpec((tm, tk), lambda i, j, k: (i, k)),   # x tile
            pl.BlockSpec((tn, tk), lambda i, j, k: (j, k)),   # weight tile
            pl.BlockSpec((tn, tk), lambda i, j, k: (j, k)),   # CP mask tile
            pl.BlockSpec((1, tn), lambda i, j, k: (0, j)),    # bias tile
        ],
        out_specs=pl.BlockSpec((tm, tn), lambda i, j, k: (i, j)),
        compiler_params=pltpu.CompilerParams(
            dimension_semantics=("parallel", "parallel", "arbitrary"),
            vmem_limit_bytes=vmem_limit),
        cost_estimate=cost,
    )(x2, w, mask, b)

    return jnp.reshape(out, orig_shape[:-1] + (out_features,))


# ----------------------------------------------------------------------------
# Param init mirroring nn.Linear.reset_parameters()
# ----------------------------------------------------------------------------

def init_cp_linear_params(key, in_features, out_features):
    k_w, k_b, k_m = jax.random.split(key, 3)
    # kaiming_uniform_(a=sqrt(5)) on (out, in) -> U(-sqrt(1/fan_in), sqrt(1/fan_in))
    bound_w = math.sqrt(1.0 / in_features)
    weight = jax.random.uniform(
        k_w, (out_features, in_features), jnp.float32, -bound_w, bound_w)
    bound_b = 1.0 / math.sqrt(in_features)
    bias = jax.random.uniform(
        k_b, (out_features,), jnp.float32, -bound_b, bound_b)
    # CP_mask is supplied externally in the PyTorch module; build a
    # deterministic binary sparsity mask here.
    cp_mask = (jax.random.uniform(k_m, (out_features, in_features)) > 0.5
               ).astype(jnp.float32)
    return weight, bias, cp_mask


if __name__ == "__main__":
    in_features = 32
    out_features = 16
    batch_dims = (2, 4)   # arbitrary leading dims, as F.linear allows

    key = jax.random.PRNGKey(0)
    k_x, k_p = jax.random.split(key)

    x = jax.random.normal(k_x, batch_dims + (in_features,), dtype=jnp.float32)
    weight, bias, cp_mask = init_cp_linear_params(k_p, in_features, out_features)

    # Plain-JAX reference (matches the PyTorch .float() forward).
    y_ref = jnp.einsum("...i,oi->...o", x, weight * cp_mask) + bias

    # Default f32 path (PyTorch-parity semantics).
    y = jax.block_until_ready(cp_linear(x, weight, cp_mask, bias))
    assert y.shape == batch_dims + (out_features,)
    assert jnp.allclose(y, y_ref, atol=1e-5, rtol=1e-5)

    # bf16 MXU-operand fast path (f32 accumulation) — looser tolerance.
    y_bf16 = jax.block_until_ready(
        cp_linear(x, weight, cp_mask, bias, compute_dtype=jnp.bfloat16))
    assert y_bf16.shape == batch_dims + (out_features,)
    assert jnp.allclose(y_bf16, y_ref, atol=5e-2, rtol=5e-2)

    print("KERNEL_OK")
</pallas_src>

<mosaic_0001>
module attributes {stable_mosaic.version = 11 : i64} {
  func.func @_cp_linear_kernel(%arg0: i32, %arg1: i32, %arg2: i32, %arg3: memref<8x128xf32, #tpu.memory_space<vmem>>, %arg4: memref<16x128xf32, #tpu.memory_space<vmem>>, %arg5: memref<16x128xf32, #tpu.memory_space<vmem>>, %arg6: memref<1x16xf32, #tpu.memory_space<vmem>>, %arg7: memref<8x16xf32, #tpu.memory_space<vmem>>) attributes {dimension_semantics = [#tpu.dimension_semantics<parallel>, #tpu.dimension_semantics<parallel>, #tpu.dimension_semantics<arbitrary>], iteration_bounds = array<i64: 1, 1, 1>, scalar_prefetch = 0 : i64, scratch_operands = 0 : i64, tpu.core_type = #tpu.core_type<tc>, window_params = [{transform_indices = @transform_0, window_bounds = array<i64: 8, 128>}, {transform_indices = @transform_1, window_bounds = array<i64: 16, 128>}, {transform_indices = @transform_2, window_bounds = array<i64: 16, 128>}, {transform_indices = @transform_3, window_bounds = array<i64: 1, 16>}, {transform_indices = @transform_4, window_bounds = array<i64: 8, 16>}]} {
    %c0_i32 = arith.constant 0 : i32
    %0 = arith.cmpi eq, %arg2, %c0_i32 : i32
    %1 = arith.extui %0 : i1 to i32
    %c0_i32_0 = arith.constant 0 : i32
    %2 = arith.cmpi ne, %1, %c0_i32_0 : i32
    scf.if %2 {
      %c0_10 = arith.constant 0 : index
      %c0_11 = arith.constant 0 : index
      %11 = vector.load %arg6[%c0_10, %c0_11] : memref<1x16xf32, #tpu.memory_space<vmem>>, vector<1x16xf32>
      %12 = vector.shape_cast %11 : vector<1x16xf32> to vector<1x16xf32>
      %13 = vector.broadcast %12 : vector<1x16xf32> to vector<8x16xf32>
      %c0_12 = arith.constant 0 : index
      %c0_13 = arith.constant 0 : index
      %14 = vector.load %arg7[%c0_12, %c0_13] : memref<8x16xf32, #tpu.memory_space<vmem>>, vector<8x16xf32>
      tpu.vector_store %arg7[%c0_12, %c0_13], %13 {strides = array<i32>} : memref<8x16xf32, #tpu.memory_space<vmem>>, vector<8x16xf32>,
    } else {
    }
    %c0 = arith.constant 0 : index
    %c0_1 = arith.constant 0 : index
    %3 = vector.load %arg4[%c0, %c0_1] : memref<16x128xf32, #tpu.memory_space<vmem>>, vector<16x128xf32>
    %c0_2 = arith.constant 0 : index
    %c0_3 = arith.constant 0 : index
    %4 = vector.load %arg5[%c0_2, %c0_3] : memref<16x128xf32, #tpu.memory_space<vmem>>, vector<16x128xf32>
    %5 = arith.mulf %3, %4 : vector<16x128xf32>
    %c0_4 = arith.constant 0 : index
    %c0_5 = arith.constant 0 : index
    %6 = vector.load %arg7[%c0_4, %c0_5] : memref<8x16xf32, #tpu.memory_space<vmem>>, vector<8x16xf32>
    %c0_6 = arith.constant 0 : index
    %c0_7 = arith.constant 0 : index
    %7 = vector.load %arg3[%c0_6, %c0_7] : memref<8x128xf32, #tpu.memory_space<vmem>>, vector<8x128xf32>
    %cst = arith.constant dense<0.000000e+00> : vector<8x16xf32>
    %8 = tpu.matmul %7, %5, %cst {dimension_numbers = #tpu.dot_dimension_numbers<[1], [1], [0], [0], [0, 0, 1, 0], [], []>} : vector<8x128xf32>, vector<16x128xf32>, vector<8x16xf32> -> vector<8x16xf32>
    %9 = arith.addf %6, %8 : vector<8x16xf32>
    %c0_8 = arith.constant 0 : index
    %c0_9 = arith.constant 0 : index
    %10 = vector.load %arg7[%c0_8, %c0_9] : memref<8x16xf32, #tpu.memory_space<vmem>>, vector<8x16xf32>
    tpu.vector_store %arg7[%c0_8, %c0_9], %9 {strides = array<i32>} : memref<8x16xf32, #tpu.memory_space<vmem>>, vector<8x16xf32>,
    return
  }
  func.func @transform_0(%arg0: i32, %arg1: i32, %arg2: i32) -> (i32, i32) {
    %c0_i32 = arith.constant 0 : i32
    return %arg0, %arg2 : i32, i32
  }
  func.func @transform_1(%arg0: i32, %arg1: i32, %arg2: i32) -> (i32, i32) {
    %c0_i32 = arith.constant 0 : i32
    return %arg1, %arg2 : i32, i32
  }
  func.func @transform_2(%arg0: i32, %arg1: i32, %arg2: i32) -> (i32, i32) {
    %c0_i32 = arith.constant 0 : i32
    return %arg1, %arg2 : i32, i32
  }
  func.func @transform_3(%arg0: i32, %arg1: i32, %arg2: i32) -> (i32, i32) {
    %c0_i32 = arith.constant 0 : i32
    %c0_i32_0 = arith.constant 0 : i32
    return %c0_i32, %arg1 : i32, i32
  }
  func.func @transform_4(%arg0: i32, %arg1: i32, %arg2: i32) -> (i32, i32) {
    %c0_i32 = arith.constant 0 : i32
    return %arg0, %arg1 : i32, i32
  }
}

</mosaic_0001>

<bundles_post_ra>
// kernel: tpu_custom_call.1
= control target key start
LH: loop header
LB: loop body
LE: loop exit
PB: predicated region body
PF: predicated region fallthrough
CT: control target
= control target key end

     0   :  { %9 = vsyncpa [#allocation3], 0  ;;  %s279_s0 = inlined_call_operand.hbm [shape: f32[8,128], index: 0, kind: input, shape index: {}]   ;;  %s280_s1 = inlined_call_operand.hbm [shape: f32[16,128], index: 1, kind: input, shape index: {}]   ;;  %s281_s2 = inlined_call_operand.hbm [shape: f32[16,128], index: 2, kind: input, shape index: {}]   ;;  %s282_s3 = inlined_call_operand.vmem [shape: f32[1,16], index: 3, kind: input, shape index: {}]   ;;  %s283_s4 = inlined_call_operand.hbm [shape: f32[8,16], index: 4, kind: output, shape index: {}]  }
   0x1   :  { %10 = vsyncpa [#allocation6], 0  ;;  %s27_s17 = sshll.u32 %s280_s1, 4  ;;  %s28_s17 = int_to_ptr.hbm [resolvable:$true] %s27_s17 }
   0x2   :  { %11 = vsyncpa [#allocation4], 0  ;;  %s231_s18 = smov [#allocation5]   ;;  %s17_s22 = sshll.u32 %s279_s0, 4  ;;  %s18_s22 = int_to_ptr.hbm [resolvable:$true] %s17_s22 }
   0x3   :  { %s29_s19 = sshll.u32 %s231_s18, 4  ;;  %s232_s23 = smov 128   ;;  %s30_s19 = int_to_ptr.vmem [resolvable:$true] %s29_s19 }
   0x4   :  { %s233_s24 = smov 8   ;;  %s234_s25 = smov [#allocation2]  }
   0x5   :  { %35 = dma.hbm_to_vmem [thread:$0]  %s28_s17, 256, %s30_s19, [#allocation6], %s232_s23, %s232_s23, %s233_s24  }
   0x6   :  { %s19_s26 = sshll.u32 %s234_s25, 4  ;;  %s40_s29 = sshll.u32 %s281_s2, 4  ;;  %s20_s26 = int_to_ptr.vmem [resolvable:$true] %s19_s26  ;;  %s41_s29 = int_to_ptr.hbm [resolvable:$true] %s40_s29 }
   0x7   :  { %22 = dma.hbm_to_vmem [thread:$0]  %s18_s22, 128, %s20_s26, [#allocation3]  }
   0x8   :  { %s235_s1 = smov [#allocation7]  }
   0x9   :  { %s42_s30 = sshll.u32 %s235_s1, 4  ;;  %s43_s30 = int_to_ptr.vmem [resolvable:$true] %s42_s30 }
   0xa   :  { %48 = dma.hbm_to_vmem [thread:$0]  %s41_s29, 256, %s43_s30, [#allocation6], %s232_s23, %s232_s23, %s233_s24  }
   0xb   :  { %225 = dma.done.wait [#allocation3], 128  }
   0xc   :  { %226 = vsyncadd [#allocation3], 4294967168 }
   0xd   :  { %227 = dma.done.wait [#allocation6], 512  }
   0xe   :  { %228 = vsyncadd [#allocation6], 4294966784  ;;  %vm71_vm0 = vcmask 130048   ;;  %v128_v0 = vld [vmem:[%s282_s3] ss:$0 sm:$0xff]  ;;  %v74_v1 = vld [vmem:[#allocation5 + $0x8] sm:$0xff] }
   0xf   :  { %v76_v2 = vld [vmem:[#allocation7 + $0x8] sm:$0xff]  ;;  %v73_v3 = vld [vmem:[#allocation5] sm:$0xff]  ;;  %v75_v4 = vld [vmem:[#allocation7] sm:$0xff]  ;;  %72 = vst.msk [vmem:[#allocation8] sm:$0xff] %vm71_vm0, %v128_v0  ;;  %s236_s2 = smov [#allocation8]   ;;  %s111_s9 = sshll.u32 %s283_s4, 4  ;;  %s112_s9 = int_to_ptr.hbm [resolvable:$true] %s111_s9 }
  0x10   :  { %v78_v5 = vmul.f32 %v76_v2, %v74_v1  ;;  %v77_v6 = vmul.f32 %v75_v4, %v73_v3  ;;  %v80_v7 = vld [vmem:[#allocation2] sm:$0xff]  ;;  %s109_s6 = sshll.u32 %s236_s2, 4  ;;  %s110_s6 = int_to_ptr.vmem [resolvable:$true] %s109_s6 }
  0x12   :  { %95 = vmatpush.xpose.msra.mxu0 %v78_v5 }
  0x16   :  { %96 = vmatpush.xpose.msra.mxu0 %v77_v6  ;;  %v79_v8 = vld [vmem:[#allocation8] sm:$0xff] }
  0x19   :  { %97 = vmatmul.f32.vlgmr.msra.gmra.mxu0 %v80_v7 }
  0x96   :  { %v98_v9 = vpop.f32.mrf.mxu0 }
  0x97   :  { %v101_v10 = vadd.f32 %v98_v9, %v79_v8 }
  0x99   :  { %103 = vst.msk [vmem:[#allocation8] sm:$0xff] %vm71_vm0, %v101_v10 }
  0x9a   :  { %114 = dma.vmem_to_hbm [thread:$0]  %s110_s6, 128, %s112_s9, [#allocation4]  }
  0x9b   :  { %229 = dma.done.wait [#allocation4], 128  }
  0x9c   :  { %230 = vsyncadd [#allocation4], 4294967168 }
  0x9d   :  { %119 = vsyncpa [#allocation3], 1 }
  0x9e   :  { %120 = vsyncpa [#allocation6], 1 }
  0x9f   :  { %121 = vsyncpa [#allocation4], 1 }

</bundles_post_ra>
